<compile_context>
chip_gen: v5e
topology: v5e:2x2
jax: 0.10.0
libtpu: 0.0.40
codegen_flags: <defaults>
</compile_context>

<pallas_src>
import functools

import jax
import jax.numpy as jnp
from jax.experimental import pallas as pl
from jax.experimental.pallas import tpu as pltpu

EPS = 1e-5  # nn.LayerNorm default


def _round_up(a: int, m: int) -> int:
    return (a + m - 1) // m * m


@functools.lru_cache(maxsize=1)
def _vmem_budget() -> int:
    """Generation-aware VMEM budget (~78% of physical per-core VMEM):
    ~100 MiB on 128-MiB parts (v5e/v6e), ~50 MiB on v7x (64 MiB/TC).
    Falls back to the v7x-safe value if the query is unavailable."""
    cap = 0
    try:
        cap = int(getattr(pltpu.get_tpu_info(), "vmem_capacity_bytes", 0))
    except Exception:
        cap = 0
    if cap <= 0:
        cap = 64 << 20
    return (cap * 25) // 32


def _vmem_need(tm, tn, n_tiles, d, x_isz, w_isz, g_isz) -> int:
    """Approximate VMEM footprint: pipeline buffers + in-kernel f32 temporaries."""
    w_bufs = 1 if n_tiles == 1 else 2   # weight single-buffered only when resident
    return int(
        2 * tm * d * x_isz              # x tile, double-buffered
        + 2 * tm * tn * x_isz           # out tile, double-buffered
        + w_bufs * (d * tn * w_isz + 2 * tn * 4)   # w, gamma@w, beta@w+b
        + d * g_isz                     # gamma (single-buffered)
        + 3 * tm * d * 4                # in-kernel f32 temps: xf, xf*xf, x*gamma
        + 2 * tm * tn * 4               # f32 matmul result / scaled output
        + (2 << 20))                    # compiler scratch slack


def prenorm_linear_kernel(x_ref, gamma_ref, w_ref, gw_ref, bwb_ref, o_ref, *,
                          inv_d: float):
    """Fused LayerNorm(last dim) + Linear on one (row-tile x col-tile) block.

    x_ref:   (TM, D)   unpadded input rows (true feature width)
    gamma:   (1, D)    LayerNorm weight
    w_ref:   (D, TN)   Linear weight column strip
    gw_ref:  (1, TN)   gamma @ w        (precomputed, f32)
    bwb_ref: (1, TN)   beta @ w + bias  (precomputed, f32)
    o_ref:   (TM, TN)

      out = inv * ((x*gamma) @ w) - (inv*mean) * (gamma@w) + (beta@w + b)

    The matmul operand (x*gamma) is independent of the row statistics, so the
    MXU can start immediately while the XLU reductions run; the per-row
    normalize becomes a cheap (TM, TN) post-scale.  For bf16 inputs, x*gamma
    stays bf16 (the MXU operand dtype).
    """
    x = x_ref[...]
    gamma = gamma_ref[...]
    w = w_ref[...]

    # MXU path (independent of the statistics).
    xg = x * gamma.astype(x.dtype)
    if xg.dtype != w.dtype:
        xg = xg.astype(w.dtype)
    mm = jnp.dot(xg, w, preferred_element_type=jnp.float32)       # (TM, TN) f32

    # Row statistics in f32.  One-pass sum / sum-of-squares: the two reductions
    # are independent (XLU ILP).  NOTE: E[x^2]-E[x]^2 loses precision for
    # inputs with |mean| >> std; fine for typical activations.
    xf = x.astype(jnp.float32)
    s1 = jnp.sum(xf, axis=-1, keepdims=True)
    s2 = jnp.sum(xf * xf, axis=-1, keepdims=True)
    mean = s1 * inv_d
    var = jnp.maximum(s2 * inv_d - mean * mean, 0.0)
    inv = jax.lax.rsqrt(var + EPS)                                 # (TM, 1)

    out = inv * mm + (bwb_ref[...] - (inv * mean) * gw_ref[...])
    o_ref[...] = out.astype(o_ref.dtype)


@functools.partial(jax.jit, static_argnames=("tile_rows",))
def prenorm_linear(x, gamma, beta, w, b, *, tile_rows=None):
    """x: (B, N, D) -> (B, N, D_out).  Fused PreNorm(dim, Linear(dim, d_out))."""
    B, N, D = x.shape
    D_out = w.shape[1]
    rows = B * N

    x_isz = jnp.dtype(x.dtype).itemsize
    w_isz = jnp.dtype(w.dtype).itemsize
    g_isz = jnp.dtype(gamma.dtype).itemsize
    sublane = {4: 8, 2: 16, 1: 32}.get(x_isz, 8)
    rows_r = _round_up(rows, sublane)

    # Default 512-row tiles (v6e: ~85% HBM roofline vs ~63% at 256; also halves
    # the per-step overhead fraction on v7x's faster HBM).  Capped at the
    # sublane-rounded row count; Pallas masks the partial last block.
    if tile_rows is None:
        tile_rows = 512
    tm0 = max(sublane, min(_round_up(int(tile_rows), sublane), rows_r))

    budget = _vmem_budget()

    # Candidate row tiles (never below 128 rows unless the input is smaller --
    # shrinking further only adds per-step overhead, especially on v5e).
    tm_floor = min(rows_r, max(sublane, 128))
    tm_cands, t = [], tm0
    while True:
        tm_cands.append(t)
        if t <= tm_floor:
            break
        t = max(tm_floor, _round_up(t // 2, sublane))
    # Candidate weight-column tiles: resident weight first (v5e/v6e, 128 MiB),
    # then 128-multiples (v7x's 64-MiB VMEM needs the weight tiled when large).
    tn_cands = [D_out] + [c for c in (1024, 512, 256, 128) if c < D_out]

    tm, tn = tm_cands[-1], tn_cands[-1]
    found = False
    for tm_c in tm_cands:              # prefer big row tiles ...
        for tn_c in tn_cands:          # ... and a resident weight
            if _vmem_need(tm_c, tn_c, pl.cdiv(D_out, tn_c),
                          D, x_isz, w_isz, g_isz) <= budget:
                tm, tn, found = tm_c, tn_c, True
                break
        if found:
            break
    nt = pl.cdiv(D_out, tn)
    # TODO(synk): for very large D where the x tile + a (D, tn) weight strip
    # still exceeds the v7x budget, add a K grid axis over D with an f32 VMEM
    # accumulator and pl.when init/finalize.

    grid = (pl.cdiv(rows, tm), nt)

    x2 = x.reshape(rows, D)
    gamma2 = gamma.reshape(1, D)

    # Grid-invariant (1, D_out) operands for the post-matmul correction.
    # Tiny D x D_out matvecs, computed once per call (f32 accumulation).
    hi = jax.lax.Precision.HIGHEST
    gw = jnp.dot(gamma.reshape(1, D).astype(w.dtype), w,
                 preferred_element_type=jnp.float32, precision=hi)
    bwb = (jnp.dot(beta.reshape(1, D).astype(w.dtype), w,
                   preferred_element_type=jnp.float32, precision=hi)
           + b.astype(jnp.float32).reshape(1, D_out))

    # Grid-invariant operands: the second pipeline buffer is pure VMEM waste.
    const1 = pl.Buffered(1)

    def _wspec(shape, imap):
        # Weight-side operands are grid-invariant only when the weight is
        # resident (nt == 1); otherwise let Pallas double-buffer them.
        if nt == 1:
            return pl.BlockSpec(shape, imap, pipeline_mode=const1)
        return pl.BlockSpec(shape, imap)

    in_specs = [
        # x index is constant along the column axis j -> fetched once per row
        # tile even when the weight is column-tiled.
        pl.BlockSpec((tm, D), lambda i, j: (i, 0)),
        pl.BlockSpec((1, D), lambda i, j: (0, 0), pipeline_mode=const1),  # gamma
        _wspec((D, tn), lambda i, j: (0, j)),                             # w
        _wspec((1, tn), lambda i, j: (0, j)),                             # gamma @ w
        _wspec((1, tn), lambda i, j: (0, j)),                             # beta @ w + b
    ]
    out_specs = pl.BlockSpec((tm, tn), lambda i, j: (i, j))

    w_passes = 1 if nt == 1 else pl.cdiv(rows, tm)
    cost = pl.CostEstimate(
        flops=2 * rows * D * D_out + 10 * rows * D,
        transcendentals=rows,
        bytes_accessed=(rows * D * x_isz + rows * D_out * x_isz
                        + w_passes * D * D_out * w_isz),
    )

    out = pl.pallas_call(
        functools.partial(prenorm_linear_kernel, inv_d=1.0 / D),
        out_shape=jax.ShapeDtypeStruct((rows, D_out), x.dtype),
        grid_spec=pltpu.PrefetchScalarGridSpec(
            num_scalar_prefetch=0,
            grid=grid,
            in_specs=in_specs,
            out_specs=out_specs,
        ),
        compiler_params=pltpu.CompilerParams(
            # Both axes are independent -> megacore sharding on v7x; the row
            # axis has cdiv(rows, 512) steps for typical workloads, giving an
            # even split across the two TensorCores.
            dimension_semantics=("parallel", "parallel"),
            vmem_limit_bytes=int(budget)),
        cost_estimate=cost,
    )(x2, gamma2, w, gw, bwb)

    return out.reshape(B, N, D_out)


def reference(x, gamma, beta, w, b):
    xf = x.astype(jnp.float32)
    mean = jnp.mean(xf, axis=-1, keepdims=True)
    var = jnp.mean((xf - mean) ** 2, axis=-1, keepdims=True)
    y = ((xf - mean) * jax.lax.rsqrt(var + EPS) * gamma.astype(jnp.float32)
         + beta.astype(jnp.float32))
    return y @ w.astype(jnp.float32) + b.astype(jnp.float32)


if __name__ == "__main__":
    # Small shapes: batch=2, seq=8, dim=32.
    B, N, D, D_out = 2, 8, 32, 32

    key = jax.random.PRNGKey(0)
    kx, kw, kb = jax.random.split(key, 3)

    x = jax.random.normal(kx, (B, N, D), dtype=jnp.float32)

    # nn.LayerNorm(dim) default init: weight = ones, bias = zeros.
    gamma = jnp.ones((D,), dtype=jnp.float32)
    beta = jnp.zeros((D,), dtype=jnp.float32)

    # Deterministic params for the wrapped fn (Linear D -> D_out).
    w = jax.random.normal(kw, (D, D_out), dtype=jnp.float32) * 0.05
    b = jax.random.normal(kb, (D_out,), dtype=jnp.float32) * 0.05

    ref = reference(x, gamma, beta, w, b)

    # f32 path.  The in-kernel matmul uses the MXU's default precision
    # (bf16-decomposed f32 passes), so the tolerance vs. the pure-f32
    # reference is deliberately loose.
    out = jax.block_until_ready(prenorm_linear(x, gamma, beta, w, b))
    assert out.shape == (B, N, D_out)
    err = float(jnp.max(jnp.abs(out.astype(jnp.float32) - ref)))
    assert err < 2e-2, err

    # bf16 path: exercises the bf16 MXU-operand route (x*gamma stays bf16,
    # f32 accumulation); compared against the f32 reference with loose tol.
    out_bf16 = jax.block_until_ready(prenorm_linear(
        x.astype(jnp.bfloat16), gamma.astype(jnp.bfloat16),
        beta.astype(jnp.bfloat16), w.astype(jnp.bfloat16),
        b.astype(jnp.bfloat16)))
    err_bf16 = float(jnp.max(jnp.abs(out_bf16.astype(jnp.float32) - ref)))
    assert err_bf16 < 5e-2, err_bf16

    print("KERNEL_OK")
</pallas_src>

<mosaic_0001>
module attributes {stable_mosaic.version = 11 : i64} {
  func.func @prenorm_linear_kernel(%arg0: i32, %arg1: i32, %arg2: memref<16x32xf32, #tpu.memory_space<vmem>>, %arg3: memref<1x32xf32, #tpu.memory_space<vmem>>, %arg4: memref<32x32xf32, #tpu.memory_space<vmem>>, %arg5: memref<1x32xf32, #tpu.memory_space<vmem>>, %arg6: memref<1x32xf32, #tpu.memory_space<vmem>>, %arg7: memref<16x32xf32, #tpu.memory_space<vmem>>) attributes {dimension_semantics = [#tpu.dimension_semantics<parallel>, #tpu.dimension_semantics<parallel>], iteration_bounds = array<i64: 1, 1>, scalar_prefetch = 0 : i64, scratch_operands = 0 : i64, tpu.core_type = #tpu.core_type<tc>, window_params = [{transform_indices = @transform_0, window_bounds = array<i64: 16, 32>}, {pipeline_mode = #tpu.pipeline_mode<synchronous>, transform_indices = @transform_1, window_bounds = array<i64: 1, 32>}, {pipeline_mode = #tpu.pipeline_mode<synchronous>, transform_indices = @transform_2, window_bounds = array<i64: 32, 32>}, {pipeline_mode = #tpu.pipeline_mode<synchronous>, transform_indices = @transform_3, window_bounds = array<i64: 1, 32>}, {pipeline_mode = #tpu.pipeline_mode<synchronous>, transform_indices = @transform_4, window_bounds = array<i64: 1, 32>}, {transform_indices = @transform_5, window_bounds = array<i64: 16, 32>}]} {
    %c0 = arith.constant 0 : index
    %c0_0 = arith.constant 0 : index
    %0 = vector.load %arg2[%c0, %c0_0] : memref<16x32xf32, #tpu.memory_space<vmem>>, vector<16x32xf32>
    %c0_1 = arith.constant 0 : index
    %c0_2 = arith.constant 0 : index
    %1 = vector.load %arg3[%c0_1, %c0_2] : memref<1x32xf32, #tpu.memory_space<vmem>>, vector<1x32xf32>
    %c0_3 = arith.constant 0 : index
    %c0_4 = arith.constant 0 : index
    %2 = vector.load %arg4[%c0_3, %c0_4] : memref<32x32xf32, #tpu.memory_space<vmem>>, vector<32x32xf32>
    %3 = vector.broadcast %1 : vector<1x32xf32> to vector<16x32xf32>
    %4 = arith.mulf %0, %3 : vector<16x32xf32>
    %cst = arith.constant dense<0.000000e+00> : vector<16x32xf32>
    %5 = tpu.matmul %4, %2, %cst {dimension_numbers = #tpu.dot_dimension_numbers<[1], [0], [0], [1], [0, 0, 1, 1], [], []>} : vector<16x32xf32>, vector<32x32xf32>, vector<16x32xf32> -> vector<16x32xf32>
    %cst_5 = arith.constant dense<0.000000e+00> : vector<16xf32>
    %6 = vector.multi_reduction <add>, %0, %cst_5 [1] : vector<16x32xf32> to vector<16xf32>
    %7 = vector.shape_cast %6 : vector<16xf32> to vector<16x1xf32>
    %8 = arith.mulf %0, %0 : vector<16x32xf32>
    %cst_6 = arith.constant dense<0.000000e+00> : vector<16xf32>
    %9 = vector.multi_reduction <add>, %8, %cst_6 [1] : vector<16x32xf32> to vector<16xf32>
    %10 = vector.shape_cast %9 : vector<16xf32> to vector<16x1xf32>
    %cst_7 = arith.constant 3.125000e-02 : f32
    %11 = vector.broadcast %cst_7 : f32 to vector<16x1xf32>
    %12 = arith.mulf %7, %11 : vector<16x1xf32>
    %cst_8 = arith.constant 3.125000e-02 : f32
    %13 = vector.broadcast %cst_8 : f32 to vector<16x1xf32>
    %14 = arith.mulf %10, %13 : vector<16x1xf32>
    %15 = arith.mulf %12, %12 : vector<16x1xf32>
    %16 = arith.subf %14, %15 : vector<16x1xf32>
    %cst_9 = arith.constant 0.000000e+00 : f32
    %17 = vector.broadcast %cst_9 : f32 to vector<16x1xf32>
    %18 = arith.maximumf %16, %17 : vector<16x1xf32>
    %cst_10 = arith.constant 9.99999974E-6 : f32
    %19 = vector.broadcast %cst_10 : f32 to vector<16x1xf32>
    %20 = arith.addf %18, %19 : vector<16x1xf32>
    %21 = math.rsqrt %20 : vector<16x1xf32>
    %22 = vector.broadcast %21 : vector<16x1xf32> to vector<16x32xf32>
    %23 = arith.mulf %22, %5 : vector<16x32xf32>
    %c0_11 = arith.constant 0 : index
    %c0_12 = arith.constant 0 : index
    %24 = vector.load %arg6[%c0_11, %c0_12] : memref<1x32xf32, #tpu.memory_space<vmem>>, vector<1x32xf32>
    %25 = arith.mulf %21, %12 : vector<16x1xf32>
    %c0_13 = arith.constant 0 : index
    %c0_14 = arith.constant 0 : index
    %26 = vector.load %arg5[%c0_13, %c0_14] : memref<1x32xf32, #tpu.memory_space<vmem>>, vector<1x32xf32>
    %27 = vector.broadcast %25 : vector<16x1xf32> to vector<16x32xf32>
    %28 = vector.broadcast %26 : vector<1x32xf32> to vector<16x32xf32>
    %29 = arith.mulf %27, %28 : vector<16x32xf32>
    %30 = vector.broadcast %24 : vector<1x32xf32> to vector<16x32xf32>
    %31 = arith.subf %30, %29 : vector<16x32xf32>
    %32 = arith.addf %23, %31 : vector<16x32xf32>
    %c0_15 = arith.constant 0 : index
    %c0_16 = arith.constant 0 : index
    %33 = vector.load %arg7[%c0_15, %c0_16] : memref<16x32xf32, #tpu.memory_space<vmem>>, vector<16x32xf32>
    tpu.vector_store %arg7[%c0_15, %c0_16], %32 {strides = array<i32>} : memref<16x32xf32, #tpu.memory_space<vmem>>, vector<16x32xf32>,
    return
  }
  func.func @transform_0(%arg0: i32, %arg1: i32) -> (i32, i32) {
    %c0_i32 = arith.constant 0 : i32
    %c0_i32_0 = arith.constant 0 : i32
    return %arg0, %c0_i32 : i32, i32
  }
  func.func @transform_1(%arg0: i32, %arg1: i32) -> (i32, i32) {
    %c0_i32 = arith.constant 0 : i32
    %c0_i32_0 = arith.constant 0 : i32
    %c0_i32_1 = arith.constant 0 : i32
    return %c0_i32, %c0_i32_0 : i32, i32
  }
  func.func @transform_2(%arg0: i32, %arg1: i32) -> (i32, i32) {
    %c0_i32 = arith.constant 0 : i32
    %c0_i32_0 = arith.constant 0 : i32
    return %c0_i32, %arg1 : i32, i32
  }
  func.func @transform_3(%arg0: i32, %arg1: i32) -> (i32, i32) {
    %c0_i32 = arith.constant 0 : i32
    %c0_i32_0 = arith.constant 0 : i32
    return %c0_i32, %arg1 : i32, i32
  }
  func.func @transform_4(%arg0: i32, %arg1: i32) -> (i32, i32) {
    %c0_i32 = arith.constant 0 : i32
    %c0_i32_0 = arith.constant 0 : i32
    return %c0_i32, %arg1 : i32, i32
  }
  func.func @transform_5(%arg0: i32, %arg1: i32) -> (i32, i32) {
    %c0_i32 = arith.constant 0 : i32
    return %arg0, %arg1 : i32, i32
  }
}

</mosaic_0001>

<bundles_post_ra>
// kernel: prenorm_linear.1
= control target key start
LH: loop header
LB: loop body
LE: loop exit
PB: predicated region body
PF: predicated region fallthrough
CT: control target
= control target key end

     0   :  { %10 = vsyncpa [#allocation3], 0  ;;  %s308_s0 = inlined_call_operand.hbm [shape: f32[16,32], index: 0, kind: input, shape index: {}]   ;;  %s309_s1 = inlined_call_operand.vmem [shape: f32[1,32], index: 1, kind: input, shape index: {}]   ;;  %s310_s2 = inlined_call_operand.vmem [shape: f32[32,32], index: 2, kind: input, shape index: {}]   ;;  %s311_s3 = inlined_call_operand.vmem [shape: f32[1,32], index: 3, kind: input, shape index: {}]   ;;  %s312_s4 = inlined_call_operand.vmem [shape: f32[1,32], index: 4, kind: input, shape index: {}]   ;;  %s313_s5 = inlined_call_operand.hbm [shape: f32[16,32], index: 5, kind: output, shape index: {}]  }
   0x1   :  { %11 = vsyncpa [#allocation4], 0  ;;  %s16_s20 = sshll.u32 %s308_s0, 4  ;;  %s233_s21 = smov [#allocation2]   ;;  %s17_s20 = int_to_ptr.hbm [resolvable:$true] %s16_s20 }
   0x2   :  { %s18_s22 = sshll.u32 %s233_s21, 4  ;;  %s234_s23 = smov 128   ;;  %s19_s22 = int_to_ptr.vmem [resolvable:$true] %s18_s22 }
   0x3   :  { %s235_s24 = smov 8  }
   0x4   :  { %24 = dma.hbm_to_vmem [thread:$0]  %s17_s20, 256, %s19_s22, [#allocation3], %s234_s23, %s234_s23, %s235_s24  }
   0x5   :  { %229 = dma.done.wait [#allocation3], 256  }
   0x6   :  { %230 = vsyncadd [#allocation3], 4294967040  ;;  %vm49_vm0 = vcmask 261120   ;;  %v37_v0 = vld [vmem:[#allocation2] sm:$0xff]  ;;  %v43_v1 = vld [vmem:[%s310_s2 + $0x18] sm:$0xff]  ;;  %s151_s13 = sshll.u32 %s313_s5, 4  ;;  %s152_s13 = int_to_ptr.hbm [resolvable:$true] %s151_s13 }
   0x7   :  { %v79_v2 = vsel %vm49_vm0, %v37_v0, 0.0  ;;  %v85_v3 = vmul.f32 %v37_v0, %v37_v0  ;;  %v38_v4 = vld [vmem:[#allocation2 + $0x8] sm:$0xff]  ;;  %68 = vmatpush.msra.mxu0 %v43_v1  ;;  %v42_v5 = vld [vmem:[%s310_s2 + $0x10] sm:$0xff]  ;;  %166 = vmatpush.msra.mxu1 %v43_v1  ;;  %v174_v7 = vld [vmem:[%s309_s1] ss:$0 sm:$0xff] }
   0x8   :  { %v41_v6 = vld [vmem:[%s310_s2 + $0x8] sm:$0xff]  ;;  %80 = vadd.xlane.f32.xlu0 %v79_v2  ;;  %v40_v9 = vld [vmem:[%s310_s2] sm:$0xff]  ;;  %v47_v10 = vmul.f32 %v174_v7, %v37_v0  ;;  %v48_v11 = vmul.f32 %v174_v7, %v38_v4  ;;  %v86_v12 = vmul.f32 %v38_v4, %v38_v4  ;;  %v82_v13 = vsel %vm49_vm0, %v38_v4, 0.0 }
   0x9   :  { %v87_v8 = vsel %vm49_vm0, %v85_v3, 0.0  ;;  %69 = vmatpush.msra.mxu0 %v42_v5  ;;  %167 = vmatpush.msra.mxu1 %v42_v5  ;;  %v175_v39 = vld [vmem:[%s311_s3] ss:$0 sm:$0xff]  ;;  %s236_s3 = smov [#allocation5]  }
   0xa   :  { %88 = vadd.xlane.f32.xlu1 %v87_v8  ;;  %v90_v14 = vsel %vm49_vm0, %v86_v12, 0.0  ;;  %v176_v43 = vld [vmem:[%s312_s4] ss:$0 sm:$0xff]  ;;  %s149_s11 = sshll.u32 %s236_s3, 4  ;;  %s150_s11 = int_to_ptr.vmem [resolvable:$true] %s149_s11 }
   0xb   :  { %70 = vmatpush.msra.mxu0 %v41_v6  ;;  %168 = vmatpush.msra.mxu1 %v41_v6 }
   0xd   :  { %71 = vmatpush.msra.mxu0 %v40_v9  ;;  %169 = vmatpush.msra.mxu1 %v40_v9 }
   0xe   :  { %164 = vmatmul.msk.f32.vlgmr.msra.gmra.mxu0 %vm49_vm0, %v47_v10  ;;  %165 = vmatmul.msk.f32.vlgmr.msra.gmra.mxu1 %vm49_vm0, %v48_v11 }
  0x10   :  { %83 = vadd.xlane.f32.xlu0 %v82_v13 }
  0x12   :  { %91 = vadd.xlane.f32.xlu1 %v90_v14 }
  0x7b   :  { %v81_v15 = vpop.xlane.xlu0 %80 }
  0x7c   :  { %v93_v16 = vmul.f32 0.03125, %v81_v15 }
  0x7d   :  { %v89_v17 = vpop.xlane.xlu1 %88 }
  0x7e   :  { %v97_v18 = vmul.f32 %v93_v16, %v93_v16  ;;  %v95_v19 = vmul.f32 0.03125, %v89_v17 }
  0x80   :  { %v99_v20 = vsub.f32 %v95_v19, %v97_v18 }
  0x82   :  { %v101_v21 = vmax.f32 %v99_v20, 0.0 }
  0x83   :  { %v84_v22 = vpop.xlane.xlu0 %83 }
  0x84   :  { %v103_v23 = vadd.f32 1e-05, %v101_v21  ;;  %v94_v24 = vmul.f32 0.03125, %v84_v22 }
  0x85   :  { %v92_v25 = vpop.xlane.xlu1 %91 }
  0x86   :  { %177 = vrsqrt.f32 %v103_v23  ;;  %v98_v26 = vmul.f32 %v94_v24, %v94_v24  ;;  %v96_v27 = vmul.f32 0.03125, %v92_v25  ;;  %vm111_vm2 = vweird.f32 %v103_v23 }
  0x88   :  { %v100_v28 = vsub.f32 %v96_v27, %v98_v26 }
  0x8a   :  { %v102_v29 = vmax.f32 %v100_v28, 0.0 }
  0x8b   :  { %v73_v44 = vpop.f32.mrf.mxu0  ;;  %v76_v54 = vpop.f32.mrf.mxu1 }
  0x8c   :  { %v178_v30 = vpop.eup %177  ;;  %v104_v31 = vadd.f32 1e-05, %v102_v29 }
  0x8d   :  { %v106_v32 = vmul.f32 %v178_v30, %v103_v23  ;;  %vm112_vm1 = vweird.f32 %v178_v30 }
  0x8e   :  { %179 = vrsqrt.f32 %v104_v31  ;;  %vm113_vm3 = vmor %vm111_vm2, %vm112_vm1  ;;  %vm121_vm5 = vweird.f32 %v104_v31 }
  0x8f   :  { %v107_v33 = vmul.f32 %v178_v30, %v106_v32 }
  0x91   :  { %v108_v34 = vmul.f32 0.5, %v107_v33 }
  0x93   :  { %v109_v35 = vsub.f32 1.5, %v108_v34 }
  0x94   :  { %v180_v36 = vpop.eup %179 }
  0x95   :  { %v116_v37 = vmul.f32 %v180_v36, %v104_v31  ;;  %v110_v38 = vmul.f32 %v178_v30, %v109_v35  ;;  %vm122_vm4 = vweird.f32 %v180_v36 }
  0x96   :  { %vm123_vm6 = vmor %vm121_vm5, %vm122_vm4 }
  0x97   :  { %v114_v40 = vsel %vm113_vm3, %v178_v30, %v110_v38  ;;  %v117_v41 = vmul.f32 %v180_v36, %v116_v37 }
  0x98   :  { %v128_v42 = vmul.f32 %v114_v40, %v93_v16  ;;  %v125_v48 = vmul.f32 %v114_v40, %v73_v44 }
  0x99   :  { %v118_v45 = vmul.f32 0.5, %v117_v41 }
  0x9a   :  { %v134_v46 = vmul.f32 %v175_v39, %v128_v42 }
  0x9b   :  { %v119_v47 = vsub.f32 1.5, %v118_v45 }
  0x9c   :  { %v139_v49 = vsub.f32 %v176_v43, %v134_v46 }
  0x9d   :  { %v120_v50 = vmul.f32 %v180_v36, %v119_v47 }
  0x9e   :  { %v141_v51 = vadd.f32 %v139_v49, %v125_v48 }
  0x9f   :  { %v124_v52 = vsel %vm123_vm6, %v180_v36, %v120_v50 }
  0xa0   :  { %143 = vst.msk [vmem:[#allocation5] sm:$0xff] %vm49_vm0, %v141_v51  ;;  %v129_v53 = vmul.f32 %v124_v52, %v94_v24  ;;  %v126_v56 = vmul.f32 %v124_v52, %v76_v54 }
  0xa2   :  { %v135_v55 = vmul.f32 %v175_v39, %v129_v53 }
  0xa4   :  { %v140_v57 = vsub.f32 %v176_v43, %v135_v55 }
  0xa6   :  { %v142_v58 = vadd.f32 %v140_v57, %v126_v56 }
  0xa8   :  { %144 = vst.msk [vmem:[#allocation5 + $0x8] sm:$0xff] %vm49_vm0, %v142_v58 }
  0xa9   :  { %157 = dma.vmem_to_hbm [thread:$0]  %s150_s11, 256, %s152_s13, [#allocation4], %s234_s23, %s234_s23, %s235_s24  }
  0xaa   :  { %231 = dma.done.wait [#allocation4], 256  }
  0xab   :  { %232 = vsyncadd [#allocation4], 4294967040 }
  0xac   :  { %162 = vsyncpa [#allocation3], 1 }
  0xad   :  { %163 = vsyncpa [#allocation4], 1 }

</bundles_post_ra>
